<compile_context>
chip_gen: v5e
topology: v5e:2x2
jax: 0.10.0
libtpu: 0.0.40
codegen_flags: <defaults>
</compile_context>

<pallas_src>
import jax
import jax.numpy as jnp
from jax import lax
from jax.experimental import pallas as pl
from jax.experimental.pallas import tpu as pltpu


# --------------------------------------------------------------------------
# Pallas kernel
# --------------------------------------------------------------------------
def _conv1o1_kernel(x_ref, wn_ref, o_ref):
    """Fused channel-L2-normalize + 1x1 conv for one (batch-block, spatial) tile.

    x_ref : (NB, C, TM)  input channels on sublanes, spatial tile on lanes
    wn_ref: (K, C)       L2-normalized weights (precomputed in the wrapper)
    o_ref : (NB, K, TM)  cosine-similarity maps (lane-dense store)
    """
    nb = x_ref.shape[0]
    wn = wn_ref[...]                                          # (K, C)
    for b in range(nb):                                       # static unroll (NB small)
        xb = x_ref[b]                                         # (C, TM)
        # per-pixel squared norm; torch: xnorm += (xnorm == 0) -> zero vecs stay zero
        sumsq = jnp.sum(xb * xb, axis=0, keepdims=True)       # (1, TM)  XLU reduce
        inv = lax.rsqrt(sumsq + (sumsq == 0.0).astype(jnp.float32))   # EUP slot
        # MXU matmul first, then scale the (K, TM) output by the per-lane inv:
        # diagonal scaling commutes through the channel contraction.
        s = jnp.dot(wn, xb, preferred_element_type=jnp.float32)       # (K, TM)
        o_ref[b] = (s * inv).astype(o_ref.dtype)
    # TODO(synk): the PyTorch `isnan conv1o1` debug print has no kernel
    # equivalent and does not affect outputs; omitted.


# --------------------------------------------------------------------------
# Tiling heuristic (trace-time, static shapes only)
# --------------------------------------------------------------------------
def _choose_tiling(N, C, HW, *, target_step_bytes, min_steps):
    """Pick (batch block nb, spatial tile tm, number of spatial tiles)."""
    bytes_per_lane = C * 4
    lane_target = max(128, target_step_bytes // bytes_per_lane)

    if HW % 128 != 0 or HW <= lane_target:
        tm = HW                       # full row: always a legal block extent
    else:
        # largest multiple-of-128 divisor of HW not above lane_target
        tm = 128
        k = 2
        while 128 * k <= lane_target:
            cand = 128 * k
            if HW % cand == 0:
                tm = cand
            k += 1
    n_t = pl.cdiv(HW, tm)             # exact: tm divides HW by construction

    # Fold batch elements into a step only when a full spatial row is still far
    # below the per-step byte target, and only while enough total grid steps
    # remain to keep the DMA pipeline (and both v7x TensorCores) fed.
    nb = 1
    step_bytes = bytes_per_lane * tm
    d = 2
    while d <= N:
        if N % d == 0:
            if d * step_bytes > target_step_bytes:
                break
            if (N // d) * n_t < min_steps:
                break
            nb = d
        d += 1
    return nb, tm, n_t


# --------------------------------------------------------------------------
# Wrapper
# --------------------------------------------------------------------------
def conv1o1(x, weight, *, target_step_bytes=1 << 20, min_steps=4):
    """x: (N, C, H, W) f32;  weight: (K, C, 1, 1) or (K, C).  Returns (N, K, H, W)."""
    N, C, H, W = x.shape
    K = weight.shape[0]
    HW = H * W

    # hoisted weight normalization (torch.norm(weight, dim=1) then divide)
    w2 = weight.reshape(K, C).astype(jnp.float32)
    wn = w2 / jnp.sqrt(jnp.sum(w2 * w2, axis=1, keepdims=True))

    x3 = x.reshape(N, C, HW)

    nb, tm, n_t = _choose_tiling(
        N, C, HW, target_step_bytes=target_step_bytes, min_steps=min_steps)
    grid = (N // nb, n_t)

    cost = pl.CostEstimate(
        flops=2 * N * HW * C * K + 3 * N * HW * C + N * HW * K,
        transcendentals=N * HW,                      # one rsqrt per pixel
        bytes_accessed=4 * (N * C * HW + N * K * HW + K * C),
    )

    out = pl.pallas_call(
        _conv1o1_kernel,
        out_shape=jax.ShapeDtypeStruct((N, K, HW), jnp.float32),
        grid_spec=pltpu.PrefetchScalarGridSpec(
            num_scalar_prefetch=0,
            grid=grid,
            in_specs=[
                pl.BlockSpec((nb, C, tm), lambda n, t: (n, 0, t)),
                # tiny (K, C) weight: constant index_map -> fetched once,
                # never re-fetched per grid step.
                pl.BlockSpec((K, C), lambda n, t: (0, 0)),
            ],
            out_specs=pl.BlockSpec((nb, K, tm), lambda n, t: (n, 0, t)),
        ),
        compiler_params=pltpu.CompilerParams(
            dimension_semantics=("parallel", "parallel")),
        cost_estimate=cost,
    )(x3, wn)
    return out.reshape(N, K, H, W)


# --------------------------------------------------------------------------
# Pure-JAX reference (mirrors the PyTorch ops) for a correctness check
# --------------------------------------------------------------------------
def conv1o1_ref(x, weight):
    xnorm = jnp.sqrt(jnp.sum(x * x, axis=1, keepdims=True))
    xnorm = xnorm + (xnorm == 0.0).astype(x.dtype)
    xn = x / xnorm
    w2 = weight.reshape(weight.shape[0], x.shape[1])
    wn = w2 / jnp.sqrt(jnp.sum(w2 * w2, axis=1, keepdims=True))
    return jnp.einsum("nchw,kc->nkhw", xn, wn, precision=lax.Precision.HIGHEST)


# --------------------------------------------------------------------------
if __name__ == "__main__":
    key = jax.random.PRNGKey(0)
    kx, kw = jax.random.split(key)

    # Small shapes consistent with the module (vMF 1x1 conv over feature maps).
    N, C, H, W, K = 2, 4, 16, 16, 6
    x = jax.random.normal(kx, (N, C, H, W), jnp.float32)          # NCHW
    weight = jax.random.normal(kw, (K, C, 1, 1), jnp.float32)     # conv2d 1x1 weight

    fwd = jax.jit(conv1o1)
    out = jax.block_until_ready(fwd(x, weight))

    assert out.shape == (N, K, H, W), out.shape
    assert bool(jnp.all(jnp.isfinite(out)))

    ref = conv1o1_ref(x, weight)
    max_err = float(jnp.max(jnp.abs(out - ref)))
    assert jnp.allclose(out, ref, atol=1e-3, rtol=1e-3), max_err

    print("KERNEL_OK")
</pallas_src>

<mosaic_0001>
module attributes {stable_mosaic.version = 11 : i64} {
  func.func @_conv1o1_kernel(%arg0: i32, %arg1: i32, %arg2: memref<1x4x256xf32, #tpu.memory_space<vmem>>, %arg3: memref<6x4xf32, #tpu.memory_space<vmem>>, %arg4: memref<1x6x256xf32, #tpu.memory_space<vmem>>) attributes {dimension_semantics = [#tpu.dimension_semantics<parallel>, #tpu.dimension_semantics<parallel>], iteration_bounds = array<i64: 2, 1>, scalar_prefetch = 0 : i64, scratch_operands = 0 : i64, tpu.core_type = #tpu.core_type<tc>, window_params = [{transform_indices = @transform_0, window_bounds = array<i64: 1, 4, 256>}, {pipeline_mode = #tpu.pipeline_mode<synchronous>, transform_indices = @transform_1, window_bounds = array<i64: 6, 4>}, {transform_indices = @transform_2, window_bounds = array<i64: 1, 6, 256>}]} {
    %c0 = arith.constant 0 : index
    %c0_0 = arith.constant 0 : index
    %0 = vector.load %arg3[%c0, %c0_0] : memref<6x4xf32, #tpu.memory_space<vmem>>, vector<6x4xf32>
    %c0_1 = arith.constant 0 : index
    %c0_2 = arith.constant 0 : index
    %c0_3 = arith.constant 0 : index
    %1 = vector.load %arg2[%c0_1, %c0_2, %c0_3] : memref<1x4x256xf32, #tpu.memory_space<vmem>>, vector<1x4x256xf32>
    %2 = vector.shape_cast %1 : vector<1x4x256xf32> to vector<4x256xf32>
    %3 = arith.mulf %2, %2 : vector<4x256xf32>
    %cst = arith.constant dense<0.000000e+00> : vector<256xf32>
    %4 = vector.multi_reduction <add>, %3, %cst [0] : vector<4x256xf32> to vector<256xf32>
    %5 = vector.shape_cast %4 : vector<256xf32> to vector<1x256xf32>
    %cst_4 = arith.constant 0.000000e+00 : f32
    %6 = vector.broadcast %cst_4 : f32 to vector<1x256xf32>
    %7 = arith.cmpf oeq, %5, %6 : vector<1x256xf32>
    %8 = arith.extui %7 : vector<1x256xi1> to vector<1x256xi32>
    %9 = arith.sitofp %8 : vector<1x256xi32> to vector<1x256xf32>
    %10 = arith.addf %5, %9 : vector<1x256xf32>
    %11 = math.rsqrt %10 : vector<1x256xf32>
    %cst_5 = arith.constant dense<0.000000e+00> : vector<6x256xf32>
    %12 = tpu.matmul %0, %2, %cst_5 {dimension_numbers = #tpu.dot_dimension_numbers<[1], [0], [0], [1], [0, 0, 1, 1], [], []>} : vector<6x4xf32>, vector<4x256xf32>, vector<6x256xf32> -> vector<6x256xf32>
    %13 = vector.broadcast %11 : vector<1x256xf32> to vector<6x256xf32>
    %14 = arith.mulf %12, %13 : vector<6x256xf32>
    %c0_6 = arith.constant 0 : index
    %c0_7 = arith.constant 0 : index
    %c0_8 = arith.constant 0 : index
    %15 = vector.load %arg4[%c0_6, %c0_7, %c0_8] : memref<1x6x256xf32, #tpu.memory_space<vmem>>, vector<1x6x256xf32>
    %16 = vector.shape_cast %15 : vector<1x6x256xf32> to vector<6x256xf32>
    %17 = vector.shape_cast %14 : vector<6x256xf32> to vector<1x6x256xf32>
    tpu.vector_store %arg4[%c0_6, %c0_7, %c0_8], %17 {strides = array<i32>} : memref<1x6x256xf32, #tpu.memory_space<vmem>>, vector<1x6x256xf32>,
    return
  }
  func.func @transform_0(%arg0: i32, %arg1: i32) -> (i32, i32, i32) {
    %c0_i32 = arith.constant 0 : i32
    %c0_i32_0 = arith.constant 0 : i32
    return %arg0, %c0_i32, %arg1 : i32, i32, i32
  }
  func.func @transform_1(%arg0: i32, %arg1: i32) -> (i32, i32) {
    %c0_i32 = arith.constant 0 : i32
    %c0_i32_0 = arith.constant 0 : i32
    %c0_i32_1 = arith.constant 0 : i32
    return %c0_i32, %c0_i32_0 : i32, i32
  }
  func.func @transform_2(%arg0: i32, %arg1: i32) -> (i32, i32, i32) {
    %c0_i32 = arith.constant 0 : i32
    %c0_i32_0 = arith.constant 0 : i32
    return %arg0, %c0_i32, %arg1 : i32, i32, i32
  }
}

</mosaic_0001>

<bundles_post_ra>
// kernel: conv1o1.1
= control target key start
LH: loop header
LB: loop body
LE: loop exit
PB: predicated region body
PF: predicated region fallthrough
CT: control target
= control target key end

     0   :  { %s466_s9 = smov 0   ;;  %s468_s10 = smov 0   ;;  %s506_s0 = inlined_call_operand.vmem [shape: f32[2,4,256], index: 0, kind: input, shape index: {}]   ;;  %s507_s1 = inlined_call_operand.vmem [shape: f32[6,4], index: 1, kind: input, shape index: {}]   ;;  %s508_s2 = inlined_call_operand.vmem [shape: f32[2,6,256], index: 2, kind: output, shape index: {}]  }
   0x1   :  { %s470_s11 = smov 0  }
   0x2 LB: > { %s24_s12 = sadd.s32 1, %s444_s10  ;;  %p382_p0 = scmp.ge.s32.totalorder %s448_s11, 1  ;;  %s448_s11 = sphi %s470_s11, %s12_s11   ;;  %s444_s10 = sphi %s468_s10, %s510_s10   ;;  %s440_s9 = sphi %s466_s9, %s509_s9  }
   0x3   : > { %p26_p1 = scmp.ge.s32.totalorder %s24_s12, 2  ;;  %p133_p2 = scmp.lt.s32.totalorder %s448_s11, 3 }
   0x5   : > { %s512_s12 = smov (%p26_p1, %s24_s12), 0  ;;  %p134_p3 = pnand %p382_p0, %p133_p2 }
   0x6   : > { %p164_p4 = scmp.lt.s32.totalorder (!%p134_p3), %s440_s9, 1 }
   0x7   : > { %137 = sbr.rel (%p134_p3) target bundleno = 165 (0xa5), region = 28 }
   0xc   : > { %s514_s9 = smov (!%p164_p4, %s440_s9), 1  ;;  %vm192_vm0 = vcmask 1043456   ;;  %v183_v6 = vld [vmem:[%s507_s1] sm:$0x3f]  ;;  %vm239_vm1 = vcmask 31744   ;;  %v450_v21 = vmov 0.0  }
   0xd   : > { %s395_s13 = sshll.u32 %s514_s9, 3  ;;  %s396_s19 = sshll.u32 %s514_s9, 4 }
   0xe   : > { %s171_s16 = scalar_lea.vmem %s506_s0, %s395_s13  ;;  %s181_s22 = scalar_lea.vmem %s508_s2, %s396_s19 }
   0xf   : > { %v184_v0 = vld [vmem:[%s171_s16] sm:$0xff] }
  0x10   : > { %v185_v1 = vmul.f32 %v184_v0, %v184_v0 }
  0x12   : > { %187 = vst [vmem:[#allocation1] ss:$2 sm:$0xff] %v185_v1 }
  0x19   : > { %v188_v2 = vld.sshfl [vmem:[#allocation1] sm:$0xff pattern:$0x75316420]  ;;  %v189_v3 = vld.sshfl [vmem:[#allocation1 + $0x8] sm:$0xff pattern:$0x75316420] }
  0x1a   : > { %v193_v4 = vsel %vm192_vm0, %v188_v2, 0.0  ;;  %v200_v5 = vsel %vm192_vm0, %v189_v3, 0.0  ;;  %236 = vst [vmem:[#allocation1] ss:$2 sm:$0xff] %v184_v0 }
  0x1b   : > { %v194_v9 = vrot.slane %v193_v4, 4  ;;  %v201_v10 = vrot.slane %v200_v5, 4 }
  0x1d   : > { %v195_v11 = vadd.f32 %v194_v9, %v193_v4  ;;  %v202_v12 = vadd.f32 %v201_v10, %v200_v5 }
  0x1f   : > { %v196_v13 = vrot.slane %v195_v11, 2  ;;  %v203_v14 = vrot.slane %v202_v12, 2 }
  0x21   : > { %v237_v7 = vld.sshfl [vmem:[#allocation1] sm:$0xff pattern:$0x75316420]  ;;  %v238_v8 = vld.sshfl [vmem:[#allocation1 + $0x8] sm:$0xff pattern:$0x75316420]  ;;  %v197_v15 = vadd.f32 %v196_v13, %v195_v11  ;;  %v204_v16 = vadd.f32 %v203_v14, %v202_v12 }
  0x22   : > { %389 = vmatpush.msk.msra.mxu0 %vm192_vm0, %v237_v7  ;;  %391 = vmatpush.msk.msra.mxu1 %vm192_vm0, %v238_v8 }
  0x23   : > { %390 = vmatmul.msk.f32.vlgmr.msra.gmra.mxu0 %vm239_vm1, %v183_v6  ;;  %392 = vmatmul.msk.f32.vlgmr.msra.gmra.mxu1 %vm239_vm1, %v183_v6  ;;  %v198_v17 = vrot.slane %v197_v15, 1  ;;  %v205_v18 = vrot.slane %v204_v16, 1 }
  0x25   : > { %v199_v19 = vadd.f32 %v198_v17, %v197_v15  ;;  %v206_v20 = vadd.f32 %v205_v18, %v204_v16 }
  0x27   : > { %vm207_vm2 = vcmp.eq.f32.partialorder %v199_v19, 0.0  ;;  %vm208_vm3 = vcmp.eq.f32.partialorder %v206_v20, 0.0 }
  0x28   : > { %v387_v22 = vsel %vm207_vm2, 1.0, %v450_v21  ;;  %v388_v23 = vsel %vm208_vm3, 1.0, %v450_v21 }
  0x29   : > { %v213_v24 = vadd.f32 %v387_v22, %v199_v19  ;;  %v214_v25 = vadd.f32 %v388_v23, %v206_v20 }
  0x2b   : > { %422 = vrsqrt.f32 %v213_v24  ;;  %vm221_vm4 = vweird.f32 %v213_v24  ;;  %vm231_vm6 = vweird.f32 %v214_v25 }
  0x2c   : > { %424 = vrsqrt.f32 %v214_v25 }
  0x31   : > { %v423_v26 = vpop.eup %422 }
  0x32   : > { %v425_v27 = vpop.eup %424  ;;  %v216_v28 = vmul.f32 %v423_v26, %v213_v24  ;;  %vm222_vm5 = vweird.f32 %v423_v26 }
  0x33   : > { %v226_v29 = vmul.f32 %v425_v27, %v214_v25  ;;  %vm232_vm7 = vweird.f32 %v425_v27  ;;  %vm223_vm8 = vmor %vm221_vm4, %vm222_vm5 }
  0x34   : > { %v217_v30 = vmul.f32 %v423_v26, %v216_v28  ;;  %vm233_vm9 = vmor %vm231_vm6, %vm232_vm7 }
  0x35   : > { %v227_v31 = vmul.f32 %v425_v27, %v226_v29 }
  0x36   : > { %v218_v32 = vmul.f32 0.5, %v217_v30 }
  0x37   : > { %v228_v33 = vmul.f32 0.5, %v227_v31 }
  0x38   : > { %v219_v34 = vsub.f32 1.5, %v218_v32 }
  0x39   : > { %v229_v35 = vsub.f32 1.5, %v228_v33 }
  0x3a   : > { %v220_v36 = vmul.f32 %v423_v26, %v219_v34 }
  0x3b   : > { %v230_v37 = vmul.f32 %v425_v27, %v229_v35 }
  0x3c   : > { %v224_v38 = vsel %vm223_vm8, %v423_v26, %v220_v36 }
  0x3d   : > { %v234_v39 = vsel %vm233_vm9, %v425_v27, %v230_v37 }
  0xa0   : > { %v264_v40 = vpop.f32.mrf.mxu0  ;;  %v284_v41 = vpop.f32.mrf.mxu1 }
  0xa1   : > { %v287_v42 = vmul.f32 %v264_v40, %v224_v38  ;;  %v288_v43 = vmul.f32 %v284_v41, %v234_v39 }
  0xa3   : > { %289 = vst [vmem:[%s181_s22] sm:$0x3f] %v287_v42 }
  0xa4   : > { %290 = vst [vmem:[%s181_s22 + $0x8] sm:$0x3f] %v288_v43 }
  0xa5 PF: > { %s12_s11 = sadd.s32 1, %s448_s11   ;;  %s509_s9 = smov %s444_s10 }
  0xa6   : > { %p9_p5 = scmp.ge.s32.totalorder %s12_s11, 4   ;;  %s510_s10 = smov %s512_s12 }
  0xa8   :  { %11 = sbr.rel (!%p9_p5) target bundleno = 2 (0x2), region = 58 }

</bundles_post_ra>
